<compile_context>
chip_gen: v6e
topology: v6e:2x2x1
jax: 0.10.0
libtpu: 0.0.40
codegen_flags: <defaults>
</compile_context>

<pallas_src>
import jax
import jax.numpy as jnp
from jax.experimental import pallas as pl
from jax.experimental.pallas import tpu as pltpu


def _round_up(n: int, m: int) -> int:
    return (n + m - 1) // m * m


def _make_mlp_kernel(num_layers: int, compute_dtype):
    """Pallas kernel computing the full MLP + numerically-stable softmax."""

    def kernel(*refs):
        x_ref = refs[0]
        out_ref = refs[-1]
        param_refs = refs[1:-1]  # (w0, b0, w1, b1, ..., w_{L-1}, b_{L-1})

        # Activations arrive as f32 (batch-padded only); narrow once for MXU.
        h = x_ref[...].astype(compute_dtype)
        for i in range(num_layers):
            w = param_refs[2 * i][...]          # compute_dtype (MXU input)
            b = param_refs[2 * i + 1][...]      # f32
            h = jnp.dot(h, w, preferred_element_type=jnp.float32) + b
            if i < num_layers - 1:
                # ReLU in f32, then narrow again for the next MXU pass.
                h = jnp.maximum(h, 0.0).astype(compute_dtype)

        # Stable softmax over dim=1.  All a_size lanes are real (no padding),
        # so no masking is needed.  Exact normalization (plain divide).
        m = jnp.max(h, axis=-1, keepdims=True)
        e = jnp.exp(h - m)
        denom = jnp.sum(e, axis=-1, keepdims=True)
        out_ref[...] = (e / denom).astype(out_ref.dtype)

    return kernel


def prepare_params(weights, biases, compute_dtype=jnp.bfloat16):
    """Cast/shape parameters ONCE outside the hot path (they are static)."""
    ws = [jnp.asarray(w, compute_dtype) for w in weights]
    bs = [jnp.asarray(b, jnp.float32).reshape(1, -1) for b in biases]
    return ws, bs


def policy_forward(x, weights, biases, *, block_b_max: int = 4096):
    """Run the Policy forward pass inside a single pipelined Pallas kernel.

    Args:
      x:        (B, s_size) float32 observations.
      weights:  list of (in, out) arrays from prepare_params (x @ W + b).
      biases:   list of (1, out) float32 arrays from prepare_params.
      block_b_max: cap on batch-tile rows per grid step.
    Returns:
      (B, a_size) float32 action probabilities (rows sum to 1).
    """
    num_layers = len(weights)
    B, s_size = x.shape
    a_size = weights[-1].shape[1]
    compute_dtype = weights[0].dtype

    # Adaptive batch tile: aim for >=2 grid steps for moderate B (so the
    # batch axis can split across the 2 TensorCores on v7x), capped so the
    # per-step VMEM footprint stays at a few MiB on all generations.
    tb = max(8, min(block_b_max, _round_up(pl.cdiv(B, 2), 8)))
    b_pad = _round_up(B, tb)
    grid = (b_pad // tb,)

    # Only batch padding; feature dims stay at their natural (small) sizes.
    x_p = jnp.pad(x.astype(jnp.float32), ((0, b_pad - B), (0, 0)))

    vmem = pltpu.MemorySpace.VMEM
    in_specs = [pl.BlockSpec((tb, s_size), lambda i: (i, 0), memory_space=vmem)]
    flat_params = []
    for w, b in zip(weights, biases):
        flat_params += [w, b]
        # Constant index_maps: weights/biases stay VMEM-resident, no re-DMA.
        in_specs.append(pl.BlockSpec(w.shape, lambda i: (0, 0), memory_space=vmem))
        in_specs.append(pl.BlockSpec(b.shape, lambda i: (0, 0), memory_space=vmem))
    out_spec = pl.BlockSpec((tb, a_size), lambda i: (i, 0), memory_space=vmem)

    widths = [s_size] + [w.shape[1] for w in weights]
    param_bytes = sum(int(p.size) * p.dtype.itemsize for p in flat_params)

    # VMEM budget from the real footprint (v7x has only 64 MiB physical):
    # double-buffered x/out blocks + f32 temporaries + resident params, 2x headroom.
    io_bytes = 2 * (tb * s_size * 4 + tb * a_size * 4)
    tmp_bytes = (num_layers + 3) * tb * max(widths) * 4
    vmem_limit = int(min(48 << 20,
                         max(16 << 20, 2 * (io_bytes + tmp_bytes + param_bytes))))

    cost = pl.CostEstimate(
        flops=2 * b_pad * sum(widths[i] * widths[i + 1] for i in range(num_layers)),
        transcendentals=b_pad * a_size,
        bytes_accessed=b_pad * s_size * 4 + param_bytes + b_pad * a_size * 4,
    )

    out_p = pl.pallas_call(
        _make_mlp_kernel(num_layers, compute_dtype),
        out_shape=jax.ShapeDtypeStruct((b_pad, a_size), jnp.float32),
        grid_spec=pltpu.PrefetchScalarGridSpec(
            num_scalar_prefetch=0,
            grid=grid,
            in_specs=in_specs,
            out_specs=out_spec,
        ),
        compiler_params=pltpu.CompilerParams(
            # Batch steps are independent; shards across the 2 TCs on v7x.
            # (pltpu.CORE_PARALLEL is the next thing to try if one TC idles.)
            dimension_semantics=(pltpu.PARALLEL,),
            vmem_limit_bytes=vmem_limit,
        ),
        cost_estimate=cost,
    )(x_p, *flat_params)

    return out_p[:B]  # drop batch padding only; lanes are already exact


def init_params(key, s_size, h_sizes, a_size):
    """Deterministic nn.Linear-style init: U(-1/sqrt(fan_in), 1/sqrt(fan_in))."""
    sizes = [s_size] + list(h_sizes) + [a_size]
    weights, biases = [], []
    for i in range(len(sizes) - 1):
        fan_in, fan_out = sizes[i], sizes[i + 1]
        key, kw, kb = jax.random.split(key, 3)
        bound = 1.0 / jnp.sqrt(float(fan_in))
        w = jax.random.uniform(kw, (fan_in, fan_out), jnp.float32, -bound, bound)
        b = jax.random.uniform(kb, (1, fan_out), jnp.float32, -bound, bound)
        weights.append(w)
        biases.append(b)
    return weights, biases


def _reference_forward(x, weights, biases):
    h = x
    for i, (w, b) in enumerate(zip(weights, biases)):
        h = h @ w + b
        if i < len(weights) - 1:
            h = jnp.maximum(h, 0.0)
    return jax.nn.softmax(h, axis=1)


if __name__ == "__main__":
    # Small shapes consistent with the module: s_size=8, hidden=(32, 32), a_size=4
    B, s_size, a_size = 2, 8, 4
    h_sizes = (32, 32)

    key = jax.random.PRNGKey(0)
    key, kx = jax.random.split(key)
    x = jax.random.normal(kx, (B, s_size), jnp.float32)
    weights, biases = init_params(key, s_size, h_sizes, a_size)

    ref = _reference_forward(x, weights, biases)

    # 1) f32 MXU path: near-exact vs the pure-JAX reference.
    wf, bf = prepare_params(weights, biases, compute_dtype=jnp.float32)
    probs_f32 = jax.block_until_ready(policy_forward(x, wf, bf))
    assert probs_f32.shape == (B, a_size)
    assert jnp.allclose(probs_f32, ref, atol=5e-3), (probs_f32, ref)
    assert jnp.allclose(jnp.sum(probs_f32, axis=1), 1.0, atol=1e-3)

    # 2) Default fast path (bf16 MXU inputs, f32 accumulation / elementwise).
    #    Params prepared ONCE and reused across calls (hot-path caching).
    wb, bb = prepare_params(weights, biases)
    probs = jax.block_until_ready(policy_forward(x, wb, bb))
    assert probs.shape == (B, a_size)
    assert jnp.allclose(probs, ref, atol=5e-2), (probs, ref)
    assert jnp.allclose(jnp.sum(probs, axis=1), 1.0, atol=1e-3)

    # 3) Larger batch: exercises the adaptive 2-step parallel batch grid with
    #    VMEM-resident weights (tb = 304, only 8 padded rows for B = 600).
    key, kx2 = jax.random.split(key)
    xb = jax.random.normal(kx2, (600, s_size), jnp.float32)
    probs_b = jax.block_until_ready(policy_forward(xb, wb, bb))
    ref_b = _reference_forward(xb, weights, biases)
    assert probs_b.shape == (600, a_size)
    assert jnp.allclose(probs_b, ref_b, atol=5e-2)
    assert jnp.allclose(jnp.sum(probs_b, axis=1), 1.0, atol=1e-3)

    # TODO(synk): Policy.act() (Categorical sampling + log_prob) is host-side
    # control logic around forward(); not implemented as a kernel.
    print("KERNEL_OK")
</pallas_src>

<mosaic_0001>
module attributes {stable_mosaic.version = 11 : i64} {
  func.func @kernel(%arg0: i32, %arg1: memref<8x8xf32, #tpu.memory_space<vmem>>, %arg2: memref<8x32xf32, #tpu.memory_space<vmem>>, %arg3: memref<1x32xf32, #tpu.memory_space<vmem>>, %arg4: memref<32x32xf32, #tpu.memory_space<vmem>>, %arg5: memref<1x32xf32, #tpu.memory_space<vmem>>, %arg6: memref<32x4xf32, #tpu.memory_space<vmem>>, %arg7: memref<1x4xf32, #tpu.memory_space<vmem>>, %arg8: memref<8x4xf32, #tpu.memory_space<vmem>>) attributes {dimension_semantics = [#tpu.dimension_semantics<parallel>], iteration_bounds = array<i64: 1>, scalar_prefetch = 0 : i64, scratch_operands = 0 : i64, tpu.core_type = #tpu.core_type<tc>, window_params = [{transform_indices = @transform_0, window_bounds = array<i64: 8, 8>}, {pipeline_mode = #tpu.pipeline_mode<synchronous>, transform_indices = @transform_1, window_bounds = array<i64: 8, 32>}, {pipeline_mode = #tpu.pipeline_mode<synchronous>, transform_indices = @transform_2, window_bounds = array<i64: 1, 32>}, {pipeline_mode = #tpu.pipeline_mode<synchronous>, transform_indices = @transform_3, window_bounds = array<i64: 32, 32>}, {pipeline_mode = #tpu.pipeline_mode<synchronous>, transform_indices = @transform_4, window_bounds = array<i64: 1, 32>}, {pipeline_mode = #tpu.pipeline_mode<synchronous>, transform_indices = @transform_5, window_bounds = array<i64: 32, 4>}, {pipeline_mode = #tpu.pipeline_mode<synchronous>, transform_indices = @transform_6, window_bounds = array<i64: 1, 4>}, {transform_indices = @transform_7, window_bounds = array<i64: 8, 4>}]} {
    %c0 = arith.constant 0 : index
    %c0_0 = arith.constant 0 : index
    %0 = vector.load %arg1[%c0, %c0_0] : memref<8x8xf32, #tpu.memory_space<vmem>>, vector<8x8xf32>
    %c0_1 = arith.constant 0 : index
    %c0_2 = arith.constant 0 : index
    %1 = vector.load %arg2[%c0_1, %c0_2] : memref<8x32xf32, #tpu.memory_space<vmem>>, vector<8x32xf32>
    %c0_3 = arith.constant 0 : index
    %c0_4 = arith.constant 0 : index
    %2 = vector.load %arg3[%c0_3, %c0_4] : memref<1x32xf32, #tpu.memory_space<vmem>>, vector<1x32xf32>
    %cst = arith.constant dense<0.000000e+00> : vector<8x32xf32>
    %3 = tpu.matmul %0, %1, %cst {dimension_numbers = #tpu.dot_dimension_numbers<[1], [0], [0], [1], [0, 0, 1, 1], [], []>} : vector<8x8xf32>, vector<8x32xf32>, vector<8x32xf32> -> vector<8x32xf32>
    %4 = vector.broadcast %2 : vector<1x32xf32> to vector<8x32xf32>
    %5 = arith.addf %3, %4 : vector<8x32xf32>
    %cst_5 = arith.constant 0.000000e+00 : f32
    %6 = vector.broadcast %cst_5 : f32 to vector<8x32xf32>
    %7 = arith.maximumf %5, %6 : vector<8x32xf32>
    %c0_6 = arith.constant 0 : index
    %c0_7 = arith.constant 0 : index
    %8 = vector.load %arg4[%c0_6, %c0_7] : memref<32x32xf32, #tpu.memory_space<vmem>>, vector<32x32xf32>
    %c0_8 = arith.constant 0 : index
    %c0_9 = arith.constant 0 : index
    %9 = vector.load %arg5[%c0_8, %c0_9] : memref<1x32xf32, #tpu.memory_space<vmem>>, vector<1x32xf32>
    %cst_10 = arith.constant dense<0.000000e+00> : vector<8x32xf32>
    %10 = tpu.matmul %7, %8, %cst_10 {dimension_numbers = #tpu.dot_dimension_numbers<[1], [0], [0], [1], [0, 0, 1, 1], [], []>} : vector<8x32xf32>, vector<32x32xf32>, vector<8x32xf32> -> vector<8x32xf32>
    %11 = vector.broadcast %9 : vector<1x32xf32> to vector<8x32xf32>
    %12 = arith.addf %10, %11 : vector<8x32xf32>
    %cst_11 = arith.constant 0.000000e+00 : f32
    %13 = vector.broadcast %cst_11 : f32 to vector<8x32xf32>
    %14 = arith.maximumf %12, %13 : vector<8x32xf32>
    %c0_12 = arith.constant 0 : index
    %c0_13 = arith.constant 0 : index
    %15 = vector.load %arg6[%c0_12, %c0_13] : memref<32x4xf32, #tpu.memory_space<vmem>>, vector<32x4xf32>
    %c0_14 = arith.constant 0 : index
    %c0_15 = arith.constant 0 : index
    %16 = vector.load %arg7[%c0_14, %c0_15] : memref<1x4xf32, #tpu.memory_space<vmem>>, vector<1x4xf32>
    %cst_16 = arith.constant dense<0.000000e+00> : vector<8x4xf32>
    %17 = tpu.matmul %14, %15, %cst_16 {dimension_numbers = #tpu.dot_dimension_numbers<[1], [0], [0], [1], [0, 0, 1, 1], [], []>} : vector<8x32xf32>, vector<32x4xf32>, vector<8x4xf32> -> vector<8x4xf32>
    %18 = vector.broadcast %16 : vector<1x4xf32> to vector<8x4xf32>
    %19 = arith.addf %17, %18 : vector<8x4xf32>
    %cst_17 = arith.constant dense<0xFF800000> : vector<8xf32>
    %20 = vector.multi_reduction <maximumf>, %19, %cst_17 [1] : vector<8x4xf32> to vector<8xf32>
    %21 = vector.shape_cast %20 : vector<8xf32> to vector<8x1xf32>
    %22 = vector.broadcast %21 : vector<8x1xf32> to vector<8x4xf32>
    %23 = arith.subf %19, %22 : vector<8x4xf32>
    %24 = math.exp %23 : vector<8x4xf32>
    %cst_18 = arith.constant dense<0.000000e+00> : vector<8xf32>
    %25 = vector.multi_reduction <add>, %24, %cst_18 [1] : vector<8x4xf32> to vector<8xf32>
    %26 = vector.shape_cast %25 : vector<8xf32> to vector<8x1xf32>
    %27 = vector.broadcast %26 : vector<8x1xf32> to vector<8x4xf32>
    %28 = arith.divf %24, %27 : vector<8x4xf32>
    %c0_19 = arith.constant 0 : index
    %c0_20 = arith.constant 0 : index
    %29 = vector.load %arg8[%c0_19, %c0_20] : memref<8x4xf32, #tpu.memory_space<vmem>>, vector<8x4xf32>
    tpu.vector_store %arg8[%c0_19, %c0_20], %28 {strides = array<i32>} : memref<8x4xf32, #tpu.memory_space<vmem>>, vector<8x4xf32>,
    return
  }
  func.func @transform_0(%arg0: i32) -> (i32, i32) {
    %c0_i32 = arith.constant 0 : i32
    %c0_i32_0 = arith.constant 0 : i32
    return %arg0, %c0_i32 : i32, i32
  }
  func.func @transform_1(%arg0: i32) -> (i32, i32) {
    %c0_i32 = arith.constant 0 : i32
    %c0_i32_0 = arith.constant 0 : i32
    %c0_i32_1 = arith.constant 0 : i32
    return %c0_i32, %c0_i32_0 : i32, i32
  }
  func.func @transform_2(%arg0: i32) -> (i32, i32) {
    %c0_i32 = arith.constant 0 : i32
    %c0_i32_0 = arith.constant 0 : i32
    %c0_i32_1 = arith.constant 0 : i32
    return %c0_i32, %c0_i32_0 : i32, i32
  }
  func.func @transform_3(%arg0: i32) -> (i32, i32) {
    %c0_i32 = arith.constant 0 : i32
    %c0_i32_0 = arith.constant 0 : i32
    %c0_i32_1 = arith.constant 0 : i32
    return %c0_i32, %c0_i32_0 : i32, i32
  }
  func.func @transform_4(%arg0: i32) -> (i32, i32) {
    %c0_i32 = arith.constant 0 : i32
    %c0_i32_0 = arith.constant 0 : i32
    %c0_i32_1 = arith.constant 0 : i32
    return %c0_i32, %c0_i32_0 : i32, i32
  }
  func.func @transform_5(%arg0: i32) -> (i32, i32) {
    %c0_i32 = arith.constant 0 : i32
    %c0_i32_0 = arith.constant 0 : i32
    %c0_i32_1 = arith.constant 0 : i32
    return %c0_i32, %c0_i32_0 : i32, i32
  }
  func.func @transform_6(%arg0: i32) -> (i32, i32) {
    %c0_i32 = arith.constant 0 : i32
    %c0_i32_0 = arith.constant 0 : i32
    %c0_i32_1 = arith.constant 0 : i32
    return %c0_i32, %c0_i32_0 : i32, i32
  }
  func.func @transform_7(%arg0: i32) -> (i32, i32) {
    %c0_i32 = arith.constant 0 : i32
    %c0_i32_0 = arith.constant 0 : i32
    return %arg0, %c0_i32 : i32, i32
  }
}

</mosaic_0001>

<bundles_post_ra>
// kernel: tpu_custom_call.1
= control target key start
LH: loop header
LB: loop body
LE: loop exit
PB: predicated region body
PF: predicated region fallthrough
CT: control target
= control target key end

     0   :  { %12 = vsyncpa [#allocation3], 0  ;;  %s511_s0 = inlined_call_operand.vmem [shape: f32[8,8], index: 0, kind: input, shape index: {}]   ;;  %s512_s1 = inlined_call_operand.hbm [shape: f32[8,32], index: 1, kind: input, shape index: {}]   ;;  %s513_s2 = inlined_call_operand.vmem [shape: f32[1,32], index: 2, kind: input, shape index: {}]   ;;  %s514_s3 = inlined_call_operand.vmem [shape: f32[32,32], index: 3, kind: input, shape index: {}]   ;;  %s515_s4 = inlined_call_operand.hbm [shape: f32[1,32], index: 4, kind: input, shape index: {}]   ;;  %s516_s5 = inlined_call_operand.vmem [shape: f32[32,4], index: 5, kind: input, shape index: {}]   ;;  %s517_s6 = inlined_call_operand.vmem [shape: f32[1,4], index: 6, kind: input, shape index: {}]   ;;  %s518_s7 = inlined_call_operand.vmem [shape: f32[8,4], index: 7, kind: output, shape index: {}]  }
   0x1   :  { %13 = vsyncpa [#allocation5], 0  ;;  %s420_s24 = smov [#allocation2]   ;;  %s421_s26 = smov [#allocation4]  }
   0x2   :  { %s22_s25 = sshll.u32 %s420_s24, 4  ;;  %s36_s27 = sshll.u32 %s421_s26, 4  ;;  %s23_s25 = int_to_ptr.vmem [resolvable:$true] %s22_s25  ;;  %s37_s27 = int_to_ptr.vmem [resolvable:$true] %s36_s27 }
   0x3   :  { %s384_s28 = scalar_lea.vmem %s23_s25, 128  ;;  %p389_p1 = scmp.lt.s32.totalorder %s23_s25, %s23_s25 }
   0x4   :  { %p385_p0 = scmp.ne.s32.totalorder %s23_s25, %s384_s28  ;;  %p390_p2 = scmp.lt.s32.totalorder %s384_s28, %s384_s28 }
   0x6   :  { %p391_p3 = por %p390_p2, %p389_p1 }
   0x8   :  { %p392_p4 = pnand %p391_p3, %p385_p0 }
   0xa   :  { %395 = shalt.err (!%p392_p4)
}
   0xb   :  { %25 = dma.hbm_to_vmem [thread:$0]  %s512_s1, 128, %s23_s25, [#allocation3]  }
   0xc   :  { %s404_s8 = scalar_lea.vmem %s37_s27, 16  ;;  %s408_s9 = scalar_lea.vmem %s37_s27, 32 }
   0xd   :  { %p405_p5 = scmp.ne.s32.totalorder %s37_s27, %s404_s8  ;;  %p409_p6 = scmp.lt.s32.totalorder %s37_s27, %s37_s27 }
   0xe   :  { %p410_p7 = scmp.lt.s32.totalorder %s408_s9, %s404_s8 }
  0x10   :  { %p411_p8 = por %p410_p7, %p409_p6 }
  0x12   :  { %p412_p9 = pnand %p411_p8, %p405_p5 }
  0x14   :  { %415 = shalt.err (!%p412_p9)
}
  0x15   :  { %39 = dma.hbm_to_vmem [thread:$0]  %s515_s4, 16, %s37_s27, [#allocation5]  }
  0x16   :  { %416 = dma.done.wait [#allocation3], 128  }
  0x17   :  { %417 = vsyncadd [#allocation3], 4294967168 }
  0x18   :  { %418 = dma.done.wait [#allocation5], 16  }
  0x19   :  { %419 = vsyncadd [#allocation5], 4294967280  ;;  %v422_v0 = vmov 0.0   ;;  %vm423_vm0 = vmmov 0   ;;  %vm59_vm1 = vcmask 64512   ;;  %v51_v1 = vld [vmem:[#allocation2] sm:$0xff] }
  0x1a   :  { %341 = vmatprep.subr.mxu0 %v422_v0  ;;  %343 = vmatprep.mubr.msk.f32.mxu0 %vm423_vm0, %v422_v0  ;;  %v50_v2 = vld [vmem:[%s511_s0] sm:$0xff]  ;;  %v137_v3 = vld [vmem:[%s514_s3 + $0x18] sm:$0xff]  ;;  %v136_v4 = vld [vmem:[%s514_s3 + $0x10] sm:$0xff]  ;;  %vm145_vm2 = vcmask 261120   ;;  %vm304_vm3 = vcmask 31744  }
  0x1b   :  { %346 = vmatprep.subr.mxu1 %v422_v0  ;;  %354 = vmatprep.mubr.msk.f32.mxu1 %vm423_vm0, %v422_v0  ;;  %v135_v5 = vld [vmem:[%s514_s3 + $0x8] sm:$0xff]  ;;  %v134_v6 = vld [vmem:[%s514_s3] sm:$0xff]  ;;  %v223_v7 = vld [vmem:[%s516_s5 + $0x18] sm:$0xff] }
  0x1c   :  { %342 = vmatpush3.msra.mxu0 %v51_v1  ;;  %347 = vmatpush3.msra.mxu1 %v137_v3  ;;  %v323_v8 = vld [vmem:[%s513_s2] ss:$0 sm:$0xff]  ;;  %v222_v13 = vld [vmem:[%s516_s5 + $0x10] sm:$0xff]  ;;  %v221_v14 = vld [vmem:[%s516_s5 + $0x8] sm:$0xff] }
  0x1d   :  { %344 = vmatmul.mubr.msk.f32.vlgmr.msra.gmra.mxu0 %vm59_vm1, %v50_v2  ;;  %348 = vmatprep.subr.mxu1 %v422_v0  ;;  %v220_v15 = vld [vmem:[%s516_s5] sm:$0xff]  ;;  %v325_v16 = vld [vmem:[#allocation4] ss:$0 sm:$0xff] }
  0x1e   :  { %357 = vmatprep.subr.mxu0 %v422_v0  ;;  %365 = vmatprep.mubr.msk.f32.mxu0 %vm423_vm0, %v422_v0  ;;  %v327_v21 = vld [vmem:[%s517_s6] ss:$0 sm:$0xff] }
  0x1f   :  { %349 = vmatpush3.msra.mxu1 %v136_v4  ;;  %358 = vmatpush3.msra.mxu0 %v223_v7 }
  0x20   :  { %350 = vmatprep.subr.mxu1 %v422_v0  ;;  %359 = vmatprep.subr.mxu0 %v422_v0 }
  0x21   :  { %351 = vmatpush3.msra.mxu1 %v135_v5  ;;  %360 = vmatpush3.msra.mxu0 %v222_v13 }
  0x22   :  { %352 = vmatprep.subr.mxu1 %v422_v0  ;;  %361 = vmatprep.subr.mxu0 %v422_v0 }
  0x23   :  { %353 = vmatpush3.msra.mxu1 %v134_v6  ;;  %362 = vmatpush3.msra.mxu0 %v221_v14 }
  0x24   :  { %363 = vmatprep.subr.mxu0 %v422_v0 }
  0x25   :  { %364 = vmatpush3.msra.mxu0 %v220_v15 }
  0xdd   :  { %v129_v9 = vpop.f32.mrf.mxu0 }
  0xde   :  { %v130_v10 = vadd.f32 %v323_v8, %v129_v9 }
  0xdf   :  { %v345_v11 = vpop.f32.mrf.mxu0 }
  0xe0   :  { %v133_v12 = vmax.f32 %v130_v10, 0.0 }
  0xe2   :  { %355 = vmatmul.mubr.msk.f32.vlgmr.msra.gmra.mxu1 %vm145_vm2, %v133_v12 }
 0x1a2   :  { %v215_v17 = vpop.f32.mrf.mxu1 }
 0x1a3   :  { %v216_v18 = vadd.f32 %v325_v16, %v215_v17 }
 0x1a4   :  { %v356_v19 = vpop.f32.mrf.mxu1 }
 0x1a5   :  { %v219_v20 = vmax.f32 %v216_v18, 0.0 }
 0x1a7   :  { %366 = vmatmul.mubr.msk.f32.vlgmr.msra.gmra.mxu0 %vm145_vm2, %v219_v20 }
 0x267   :  { %v300_v22 = vpop.f32.mrf.mxu0 }
 0x268   :  { %v301_v23 = vadd.f32 %v327_v21, %v300_v22 }
 0x269   :  { %v367_v24 = vpop.f32.mrf.mxu0 }
 0x26a   :  { %v305_v25 = vsel %vm304_vm3, %v301_v23, -inf }
 0x26b   :  { %306 = vmax.xlane.f32.xlu0 %v305_v25 }
 0x2f4   :  { %v307_v26 = vpop.xlane.xlu0 %306 }
 0x2f5   :  { %v308_v27 = vsub.f32 %v301_v23, %v307_v26 }
 0x2f7   :  { %v309_v28 = vmul.f32 1.442695, %v308_v27 }
 0x2f9   :  { %372 = vpow2.f32 %v309_v28 }
 0x306   :  { %v373_v29 = vpop.eup %372 }
 0x307   :  { %v311_v30 = vsel %vm304_vm3, %v373_v29, 0.0 }
 0x308   :  { %312 = vadd.xlane.f32.xlu0 %v311_v30 }
 0x391   :  { %v313_v31 = vpop.xlane.xlu0 %312 }
 0x392   :  { %374 = vrcp.f32 %v313_v31 }
 0x39f   :  { %v375_v32 = vpop.eup %374 }
 0x3a0   :  { %v315_v33 = vmul.f32 %v375_v32, %v373_v29 }
 0x3a2   :  { %316 = vst.msk [vmem:[%s518_s7] sm:$0xff] %vm304_vm3, %v315_v33 }
 0x3a3   :  { %321 = vsyncpa [#allocation3], 1 }
 0x3a4   :  { %322 = vsyncpa [#allocation5], 1 }

</bundles_post_ra>
